<compile_context>
chip_gen: v5e
topology: v5e:2x2
jax: 0.10.0
libtpu: 0.0.40
codegen_flags: <defaults>
</compile_context>

<pallas_src>
import functools

import jax
import jax.numpy as jnp
from jax.experimental import pallas as pl
from jax.experimental.pallas import tpu as pltpu

_EPS = 1e-8
# Double-buffered input tiles are kept under this budget; the scoped-VMEM
# limit handed to the compiler stays <= 48 MiB, safe on every generation
# (v5e/v6e: 128 MiB physical, v7x: 64 MiB physical).
_VMEM_INPUT_BUDGET = 40 << 20
_VMEM_LIMIT_CAP = 48 << 20


def _round_up(x, m):
    return (x + m - 1) // m * m


def _parallel_pr_kernel(enr_ref, tst_ref, cm_ref, w_ref, b_ref, out_ref, *, map_func):
    # Upcast once; all math in f32 (bf16 inputs only change HBM traffic).
    enr = enr_ref[...].astype(jnp.float32)          # [TB, D_asv]
    tst = tst_ref[...].astype(jnp.float32)          # [TB, D_asv]
    cm = cm_ref[...].astype(jnp.float32)            # [TB, D_cm]
    w = w_ref[...].astype(jnp.float32)              # [D_cm, 1]  (resident)
    b = b_ref[0]                                    # scalar bias (SMEM)

    # --- cosine similarity along the feature (lane) axis, torch eps semantics ---
    dot = jnp.sum(enr * tst, axis=-1, keepdims=True)     # [TB, 1]
    n1 = jnp.sum(enr * enr, axis=-1, keepdims=True)      # [TB, 1]
    n2 = jnp.sum(tst * tst, axis=-1, keepdims=True)      # [TB, 1]
    # dot / max(sqrt(n1*n2), eps)  ==  dot * rsqrt(max(n1*n2, eps^2))   (EUP)
    cos = dot * jax.lax.rsqrt(jnp.maximum(n1 * n2, _EPS * _EPS))

    # --- CM branch: Linear(160 -> 1) on the otherwise-idle MXU ---
    cm_score = jnp.dot(cm, w, preferred_element_type=jnp.float32) + b    # [TB, 1]

    if map_func == "sigmoid":
        # Fuse both sigmoids into a single EUP pass over [TB, 2].
        probs = jax.nn.sigmoid(jnp.concatenate([cos, cm_score], axis=-1))
        out = probs[:, 0:1] * probs[:, 1:2]
    elif map_func == "linear":
        out = (cos + 1.0) * 0.5 * jax.nn.sigmoid(cm_score)   # cos2prob_lin * p_cm
    else:
        raise ValueError("which function to calculate probability")

    out_ref[...] = out.astype(out_ref.dtype)


def parallel_pr_forward(embd_asv_enr, embd_asv_tst, embd_cm_tst, fc_w, fc_b,
                        map_func="sigmoid", tile_b=4096):
    """Pallas implementation of Parallel_PR.forward.

    embd_asv_enr, embd_asv_tst : [B, D_asv]  float32 or bfloat16
    embd_cm_tst                : [B, 160]    float32 or bfloat16
    fc_w                       : [1, 160]    float32 (nn.Linear(160, 1).weight)
    fc_b                       : [1]         float32 (nn.Linear(160, 1).bias)
    returns                    : [B, 1]      float32
    """
    B, d_asv = embd_asv_enr.shape
    assert embd_asv_tst.shape == (B, d_asv)
    assert embd_cm_tst.shape[0] == B
    d_cm = embd_cm_tst.shape[1]
    if map_func not in ("sigmoid", "linear"):
        raise ValueError("which function to calculate probability")

    fc_w = jnp.asarray(fc_w, jnp.float32).reshape(d_cm, 1)   # [D_cm, 1] for the MXU
    fc_b = jnp.asarray(fc_b, jnp.float32).reshape(1)

    # ---- batch tiling -------------------------------------------------------
    asv_bytes = jnp.dtype(embd_asv_enr.dtype).itemsize
    cm_bytes = jnp.dtype(embd_cm_tst.dtype).itemsize
    # VMEM bytes per row once feature dims are lane-padded to 128 (+ output).
    row_bytes = (2 * _round_up(d_asv, 128) * asv_bytes
                 + _round_up(d_cm, 128) * cm_bytes
                 + 128 * 4)
    # Largest tile whose double-buffered footprint fits the VMEM budget.
    max_tb = max(8, (_VMEM_INPUT_BUDGET // (2 * row_bytes)) // 8 * 8)
    tile_b = max(8, _round_up(int(tile_b), 8))
    tile_b = min(tile_b, max_tb)

    b8 = _round_up(B, 8)
    rows8 = b8 // 8
    n_tiles = -(-b8 // tile_b)
    # Keep >=2 balanced grid steps on larger batches so the "parallel" batch
    # axis feeds both of v7x's TensorCores (no effect on single-TC v5e/v6e).
    if n_tiles == 1 and b8 >= 512:
        n_tiles = 2
    tb = 8 * (-(-rows8 // n_tiles))          # balanced per-tile rows, multiple of 8
    b_pad = n_tiles * tb

    if b_pad != B:
        pad = b_pad - B
        embd_asv_enr = jnp.pad(embd_asv_enr, ((0, pad), (0, 0)))
        embd_asv_tst = jnp.pad(embd_asv_tst, ((0, pad), (0, 0)))
        embd_cm_tst = jnp.pad(embd_cm_tst, ((0, pad), (0, 0)))

    vmem_limit = int(min(_VMEM_LIMIT_CAP,
                         max(32 << 20, 2 * tb * row_bytes + (4 << 20))))

    kernel = functools.partial(_parallel_pr_kernel, map_func=map_func)
    out = pl.pallas_call(
        kernel,
        out_shape=jax.ShapeDtypeStruct((b_pad, 1), jnp.float32),
        grid=(n_tiles,),
        in_specs=[
            pl.BlockSpec((tb, d_asv), lambda i: (i, 0)),
            pl.BlockSpec((tb, d_asv), lambda i: (i, 0)),
            pl.BlockSpec((tb, d_cm), lambda i: (i, 0)),
            pl.BlockSpec((d_cm, 1), lambda i: (0, 0)),            # weight: resident
            pl.BlockSpec(memory_space=pltpu.MemorySpace.SMEM),    # bias: SMEM scalar
        ],
        out_specs=pl.BlockSpec((tb, 1), lambda i: (i, 0)),
        compiler_params=pltpu.CompilerParams(
            dimension_semantics=("parallel",),                    # megacore on v7x
            vmem_limit_bytes=vmem_limit),
    )(embd_asv_enr, embd_asv_tst, embd_cm_tst, fc_w, fc_b)

    return out[:B]


def _reference(embd_asv_enr, embd_asv_tst, embd_cm_tst, fc_w, fc_b, map_func="sigmoid"):
    enr = embd_asv_enr.astype(jnp.float32)
    tst = embd_asv_tst.astype(jnp.float32)
    cm = embd_cm_tst.astype(jnp.float32)
    dot = jnp.sum(enr * tst, axis=-1, keepdims=True)
    n1 = jnp.linalg.norm(enr, axis=-1, keepdims=True)
    n2 = jnp.linalg.norm(tst, axis=-1, keepdims=True)
    cos = dot / jnp.maximum(n1 * n2, _EPS)
    p_sv = jax.nn.sigmoid(cos) if map_func == "sigmoid" else (cos + 1.0) / 2.0
    p_cm = jax.nn.sigmoid(cm @ jnp.asarray(fc_w, jnp.float32).reshape(-1, 1)
                          + jnp.asarray(fc_b, jnp.float32).reshape(()))
    return p_sv * p_cm


if __name__ == "__main__":
    key = jax.random.PRNGKey(0)
    k_enr, k_tst, k_cm, k_w, k_b = jax.random.split(key, 5)

    B = 8            # batch
    D_ASV = 192      # ASV embedding dim (any feature dim works; dim=1 reduction)
    D_CM = 160       # CM embedding dim, fixed by nn.Linear(160, 1)

    embd_asv_enr = jax.random.normal(k_enr, (B, D_ASV), dtype=jnp.float32)
    embd_asv_tst = jax.random.normal(k_tst, (B, D_ASV), dtype=jnp.float32)
    embd_cm_tst = jax.random.normal(k_cm, (B, D_CM), dtype=jnp.float32)

    # Deterministic nn.Linear(160, 1)-style init: U(-1/sqrt(160), 1/sqrt(160)).
    bound = 1.0 / (D_CM ** 0.5)
    fc_w = jax.random.uniform(k_w, (1, D_CM), minval=-bound, maxval=bound,
                              dtype=jnp.float32)
    fc_b = jax.random.uniform(k_b, (1,), minval=-bound, maxval=bound,
                              dtype=jnp.float32)

    # 1) f32, single tile, sigmoid map.
    out = jax.block_until_ready(
        parallel_pr_forward(embd_asv_enr, embd_asv_tst, embd_cm_tst, fc_w, fc_b))
    ref = _reference(embd_asv_enr, embd_asv_tst, embd_cm_tst, fc_w, fc_b)
    assert out.shape == (B, 1)
    assert jnp.allclose(out, ref, atol=1e-4, rtol=1e-4), (out, ref)

    # 2) linear (cos2prob_lin) map.
    out_lin = jax.block_until_ready(
        parallel_pr_forward(embd_asv_enr, embd_asv_tst, embd_cm_tst, fc_w, fc_b,
                            map_func="linear"))
    ref_lin = _reference(embd_asv_enr, embd_asv_tst, embd_cm_tst, fc_w, fc_b,
                         map_func="linear")
    assert jnp.allclose(out_lin, ref_lin, atol=1e-4, rtol=1e-4), (out_lin, ref_lin)

    # 3) multi-tile grid + batch padding + bf16 inputs (halved HBM traffic path).
    B2 = 300
    k1, k2, k3 = jax.random.split(jax.random.PRNGKey(1), 3)
    enr2 = jax.random.normal(k1, (B2, D_ASV), dtype=jnp.float32)
    tst2 = jax.random.normal(k2, (B2, D_ASV), dtype=jnp.float32)
    cm2 = jax.random.normal(k3, (B2, D_CM), dtype=jnp.float32)
    out2 = jax.block_until_ready(
        parallel_pr_forward(enr2.astype(jnp.bfloat16), tst2.astype(jnp.bfloat16),
                            cm2.astype(jnp.bfloat16), fc_w, fc_b, tile_b=128))
    ref2 = _reference(enr2, tst2, cm2, fc_w, fc_b)
    assert out2.shape == (B2, 1)
    assert jnp.allclose(out2, ref2, atol=2e-2, rtol=0.0), (out2, ref2)

    print("KERNEL_OK")
</pallas_src>

<mosaic_0001>
module attributes {stable_mosaic.version = 11 : i64} {
  func.func @_parallel_pr_kernel(%arg0: i32, %arg1: memref<8x192xf32, #tpu.memory_space<vmem>>, %arg2: memref<8x192xf32, #tpu.memory_space<vmem>>, %arg3: memref<8x160xf32, #tpu.memory_space<vmem>>, %arg4: memref<160x1xf32, #tpu.memory_space<vmem>>, %arg5: memref<1xf32, #tpu.memory_space<smem>>, %arg6: memref<8x1xf32, #tpu.memory_space<vmem>>) attributes {dimension_semantics = [#tpu.dimension_semantics<parallel>], iteration_bounds = array<i64: 1>, scalar_prefetch = 0 : i64, scratch_operands = 0 : i64, tpu.core_type = #tpu.core_type<tc>, window_params = [{transform_indices = @transform_0, window_bounds = array<i64: 8, 192>}, {transform_indices = @transform_1, window_bounds = array<i64: 8, 192>}, {transform_indices = @transform_2, window_bounds = array<i64: 8, 160>}, {pipeline_mode = #tpu.pipeline_mode<synchronous>, transform_indices = @transform_3, window_bounds = array<i64: 160, 1>}, {transform_indices = @transform_4, window_bounds = array<i64: 1>}, {transform_indices = @transform_5, window_bounds = array<i64: 8, 1>}]} {
    %c0 = arith.constant 0 : index
    %c0_0 = arith.constant 0 : index
    %0 = vector.load %arg1[%c0, %c0_0] : memref<8x192xf32, #tpu.memory_space<vmem>>, vector<8x192xf32>
    %c0_1 = arith.constant 0 : index
    %c0_2 = arith.constant 0 : index
    %1 = vector.load %arg2[%c0_1, %c0_2] : memref<8x192xf32, #tpu.memory_space<vmem>>, vector<8x192xf32>
    %c0_3 = arith.constant 0 : index
    %c0_4 = arith.constant 0 : index
    %2 = vector.load %arg3[%c0_3, %c0_4] : memref<8x160xf32, #tpu.memory_space<vmem>>, vector<8x160xf32>
    %c0_5 = arith.constant 0 : index
    %c0_6 = arith.constant 0 : index
    %3 = vector.load %arg4[%c0_5, %c0_6] : memref<160x1xf32, #tpu.memory_space<vmem>>, vector<160x1xf32>
    %c0_7 = arith.constant 0 : index
    %4 = memref.load %arg5[%c0_7] : memref<1xf32, #tpu.memory_space<smem>>
    %5 = arith.mulf %0, %1 : vector<8x192xf32>
    %cst = arith.constant dense<0.000000e+00> : vector<8xf32>
    %6 = vector.multi_reduction <add>, %5, %cst [1] : vector<8x192xf32> to vector<8xf32>
    %7 = vector.shape_cast %6 : vector<8xf32> to vector<8x1xf32>
    %8 = arith.mulf %0, %0 : vector<8x192xf32>
    %cst_8 = arith.constant dense<0.000000e+00> : vector<8xf32>
    %9 = vector.multi_reduction <add>, %8, %cst_8 [1] : vector<8x192xf32> to vector<8xf32>
    %10 = vector.shape_cast %9 : vector<8xf32> to vector<8x1xf32>
    %11 = arith.mulf %1, %1 : vector<8x192xf32>
    %cst_9 = arith.constant dense<0.000000e+00> : vector<8xf32>
    %12 = vector.multi_reduction <add>, %11, %cst_9 [1] : vector<8x192xf32> to vector<8xf32>
    %13 = vector.shape_cast %12 : vector<8xf32> to vector<8x1xf32>
    %14 = arith.mulf %10, %13 : vector<8x1xf32>
    %cst_10 = arith.constant 1.000000e-16 : f32
    %15 = vector.broadcast %cst_10 : f32 to vector<8x1xf32>
    %16 = arith.maximumf %14, %15 : vector<8x1xf32>
    %17 = math.rsqrt %16 : vector<8x1xf32>
    %18 = arith.mulf %7, %17 : vector<8x1xf32>
    %cst_11 = arith.constant dense<0.000000e+00> : vector<8x1xf32>
    %19 = tpu.matmul %2, %3, %cst_11 {dimension_numbers = #tpu.dot_dimension_numbers<[1], [0], [0], [1], [0, 0, 1, 1], [], []>} : vector<8x160xf32>, vector<160x1xf32>, vector<8x1xf32> -> vector<8x1xf32>
    %20 = vector.broadcast %4 : f32 to vector<8x1xf32>
    %21 = arith.addf %19, %20 : vector<8x1xf32>
    %22 = tpu.concatenate %18, %21 in 1 : vector<8x1xf32>, vector<8x1xf32> -> vector<8x2xf32>
    %23 = arith.negf %22 : vector<8x2xf32>
    %24 = math.exp %23 : vector<8x2xf32>
    %cst_12 = arith.constant 1.000000e+00 : f32
    %25 = vector.broadcast %cst_12 : f32 to vector<8x2xf32>
    %26 = arith.addf %25, %24 : vector<8x2xf32>
    %27 = arith.divf %25, %26 : vector<8x2xf32>
    %28 = vector.extract_strided_slice %27 {offsets = [0, 0], sizes = [8, 1], strides = [1, 1]} : vector<8x2xf32> to vector<8x1xf32>
    %29 = vector.extract_strided_slice %27 {offsets = [0, 1], sizes = [8, 1], strides = [1, 1]} : vector<8x2xf32> to vector<8x1xf32>
    %30 = arith.mulf %28, %29 : vector<8x1xf32>
    %c0_13 = arith.constant 0 : index
    %c0_14 = arith.constant 0 : index
    %31 = vector.load %arg6[%c0_13, %c0_14] : memref<8x1xf32, #tpu.memory_space<vmem>>, vector<8x1xf32>
    tpu.vector_store %arg6[%c0_13, %c0_14], %30 {strides = array<i32>} : memref<8x1xf32, #tpu.memory_space<vmem>>, vector<8x1xf32>,
    return
  }
  func.func @transform_0(%arg0: i32) -> (i32, i32) {
    %c0_i32 = arith.constant 0 : i32
    %c0_i32_0 = arith.constant 0 : i32
    return %arg0, %c0_i32 : i32, i32
  }
  func.func @transform_1(%arg0: i32) -> (i32, i32) {
    %c0_i32 = arith.constant 0 : i32
    %c0_i32_0 = arith.constant 0 : i32
    return %arg0, %c0_i32 : i32, i32
  }
  func.func @transform_2(%arg0: i32) -> (i32, i32) {
    %c0_i32 = arith.constant 0 : i32
    %c0_i32_0 = arith.constant 0 : i32
    return %arg0, %c0_i32 : i32, i32
  }
  func.func @transform_3(%arg0: i32) -> (i32, i32) {
    %c0_i32 = arith.constant 0 : i32
    %c0_i32_0 = arith.constant 0 : i32
    %c0_i32_1 = arith.constant 0 : i32
    return %c0_i32, %c0_i32_0 : i32, i32
  }
  func.func @transform_4(%arg0: i32) -> i32 {
    %c0_i32 = arith.constant 0 : i32
    %c0_i32_0 = arith.constant 0 : i32
    return %c0_i32 : i32
  }
  func.func @transform_5(%arg0: i32) -> (i32, i32) {
    %c0_i32 = arith.constant 0 : i32
    %c0_i32_0 = arith.constant 0 : i32
    return %arg0, %c0_i32 : i32, i32
  }
}

</mosaic_0001>

<bundles_post_ra>
// kernel: tpu_custom_call.1
= control target key start
LH: loop header
LB: loop body
LE: loop exit
PB: predicated region body
PF: predicated region fallthrough
CT: control target
= control target key end

     0   :  { %vm50_vm0 = vcmask 523264   ;;  %vm81_vm1 = vcmask 261120   ;;  %s170_s20 = smov 1   ;;  %vm129_vm5 = vcmask 7168   ;;  %s291_s3 = inlined_call_operand.vmem [shape: f32[160,1], index: 3, kind: input, shape index: {}]   ;;  %s292_s0 = inlined_call_operand.vmem [shape: f32[8,192], index: 0, kind: input, shape index: {}]   ;;  %s293_s1 = inlined_call_operand.vmem [shape: f32[8,192], index: 1, kind: input, shape index: {}]   ;;  %s294_s2 = inlined_call_operand.vmem [shape: f32[8,160], index: 2, kind: input, shape index: {}]   ;;  %s295_s4 = inlined_call_operand.<no memory space> [shape: f32[1], index: 4, kind: input, shape index: {}]   ;;  %s296_s5 = inlined_call_operand.vmem [shape: f32[8,1], index: 5, kind: output, shape index: {}]  }
   0x1   :  { %v42_v0 = vld [vmem:[%s291_s3 + $0x78] sm:$0xff]  ;;  %v41_v1 = vld [vmem:[%s291_s3 + $0x70] sm:$0xff]  ;;  %v40_v2 = vld [vmem:[%s291_s3 + $0x68] sm:$0xff]  ;;  %v80_v38 = vstv %s295_s4 }
   0x2   :  { %85 = vmatpush.msra.mxu0 %v42_v0  ;;  %v39_v3 = vld [vmem:[%s291_s3 + $0x60] sm:$0xff]  ;;  %v46_v4 = vld [vmem:[%s291_s3 + $0x98] sm:$0xff]  ;;  %v45_v5 = vld [vmem:[%s291_s3 + $0x90] sm:$0xff] }
   0x3   :  { %117 = vmatpush.msra.mxu1 %v46_v4  ;;  %v38_v6 = vld [vmem:[%s291_s3 + $0x58] sm:$0xff]  ;;  %v44_v7 = vld [vmem:[%s291_s3 + $0x88] sm:$0xff]  ;;  %v37_v8 = vld [vmem:[%s291_s3 + $0x50] sm:$0xff] }
   0x4   :  { %86 = vmatpush.msra.mxu0 %v41_v1  ;;  %v21_v9 = vld [vmem:[%s292_s0] sm:$0xff]  ;;  %v22_v10 = vld [vmem:[%s292_s0 + $0x8] sm:$0xff]  ;;  %v34_v27 = vld [vmem:[%s291_s3 + $0x38] sm:$0xff] }
   0x5   :  { %118 = vmatpush.msra.mxu1 %v45_v5  ;;  %v43_v11 = vld [vmem:[%s291_s3 + $0x80] sm:$0xff]  ;;  %v55_v12 = vmul.f32 %v21_v9, %v21_v9  ;;  %v56_v13 = vmul.f32 %v22_v10, %v22_v10  ;;  %v24_v15 = vld [vmem:[%s293_s1 + $0x8] sm:$0xff]  ;;  %v33_v29 = vld [vmem:[%s291_s3 + $0x30] sm:$0xff] }
   0x6   :  { %87 = vmatpush.msra.mxu0 %v40_v2  ;;  %v23_v14 = vld [vmem:[%s293_s1] sm:$0xff]  ;;  %v26_v16 = vld [vmem:[%s294_s2 + $0x8] sm:$0xff]  ;;  %v62_v20 = vmul.f32 %v24_v15, %v24_v15  ;;  %v49_v21 = vmul.f32 %v24_v15, %v22_v10  ;;  %v30_v33 = vld [vmem:[%s291_s3 + $0x18] sm:$0xff] }
   0x7   :  { %119 = vmatpush.msra.mxu1 %v44_v7  ;;  %v48_v17 = vmul.f32 %v23_v14, %v21_v9  ;;  %v36_v18 = vld [vmem:[%s291_s3 + $0x48] sm:$0xff]  ;;  %v57_v19 = vsel %vm50_vm0, %v56_v13, 0.0  ;;  %v35_v23 = vld [vmem:[%s291_s3 + $0x40] sm:$0xff]  ;;  %v61_v25 = vmul.f32 %v23_v14, %v23_v14  ;;  %v29_v34 = vld [vmem:[%s291_s3 + $0x10] sm:$0xff] }
   0x8   :  { %88 = vmatpush.msra.mxu0 %v39_v3  ;;  %v58_v22 = vadd.f32 %v57_v19, %v55_v12  ;;  %v51_v24 = vsel %vm50_vm0, %v49_v21, 0.0  ;;  %v63_v28 = vsel %vm50_vm0, %v62_v20, 0.0  ;;  %v32_v31 = vld [vmem:[%s291_s3 + $0x28] sm:$0xff]  ;;  %v31_v32 = vld [vmem:[%s291_s3 + $0x20] sm:$0xff] }
   0x9   :  { %120 = vmatpush.msra.mxu1 %v43_v11  ;;  %v52_v26 = vadd.f32 %v51_v24, %v48_v17  ;;  %v64_v30 = vadd.f32 %v63_v28, %v61_v25  ;;  %v28_v35 = vld [vmem:[%s291_s3 + $0x8] sm:$0xff]  ;;  %v27_v36 = vld [vmem:[%s291_s3] sm:$0xff] }
   0xa   :  { %89 = vmatpush.msra.mxu0 %v38_v6  ;;  %160 = vmatmul.msk.f32.vlgmr.msra.gmra.mxu1 %vm81_vm1, %v26_v16  ;;  %v25_v37 = vld [vmem:[%s294_s2] sm:$0xff]  ;;  %s171_s2 = smov 127  }
   0xb   :  { %59 = vadd.xlane.f32.xlu0 %v58_v22  ;;  %53 = vadd.xlane.f32.xlu1 %v52_v26 }
   0xc   :  { %90 = vmatpush.msra.mxu0 %v37_v8 }
   0xe   :  { %91 = vmatpush.msra.mxu0 %v36_v18 }
  0x10   :  { %92 = vmatpush.msra.mxu0 %v35_v23 }
  0x12   :  { %93 = vmatpush.msra.mxu0 %v34_v27 }
  0x13   :  { %65 = vadd.xlane.f32.xlu0 %v64_v30 }
  0x14   :  { %94 = vmatpush.msra.mxu0 %v33_v29 }
  0x16   :  { %95 = vmatpush.msra.mxu0 %v32_v31 }
  0x18   :  { %96 = vmatpush.msra.mxu0 %v31_v32 }
  0x1a   :  { %97 = vmatpush.msra.mxu0 %v30_v33 }
  0x1c   :  { %98 = vmatpush.msra.mxu0 %v29_v34 }
  0x1e   :  { %99 = vmatpush.msra.mxu0 %v28_v35 }
  0x20   :  { %100 = vmatpush.msra.mxu0 %v27_v36 }
  0x21   :  { %101 = vmatmul.f32.vlgmr.msra.gmra.mxu0 %v25_v37 }
  0x7e   :  { %v60_v43 = vpop.xlane.xlu0 %59  ;;  %v54_v53 = vpop.xlane.xlu1 %53 }
  0x86   :  { %v66_v44 = vpop.xlane.xlu0 %65 }
  0x87   :  { %v122_v40 = vpop.f32.mrf.mxu1  ;;  %v67_v45 = vmul.f32 %v66_v44, %v60_v43 }
  0x89   :  { %v68_v46 = vmax.f32 %v67_v45, 1e-16 }
  0x8b   :  { %164 = vrsqrt.f32 %v68_v46  ;;  %vm75_vm2 = vweird.f32 %v68_v46 }
  0x91   :  { %v165_v47 = vpop.eup %164 }
  0x92   :  { %v70_v48 = vmul.f32 %v165_v47, %v68_v46  ;;  %vm76_vm3 = vweird.f32 %v165_v47 }
  0x93   :  { %vm77_vm4 = vmor %vm75_vm2, %vm76_vm3 }
  0x94   :  { %v71_v49 = vmul.f32 %v165_v47, %v70_v48 }
  0x96   :  { %v72_v50 = vmul.f32 0.5, %v71_v49 }
  0x98   :  { %v73_v51 = vsub.f32 1.5, %v72_v50 }
  0x9a   :  { %v74_v52 = vmul.f32 %v165_v47, %v73_v51 }
  0x9c   :  { %v78_v54 = vsel %vm77_vm4, %v165_v47, %v74_v52 }
  0x9d   :  { %v79_v55 = vmul.f32 %v78_v54, %v54_v53 }
  0x9e   :  { %v102_v39 = vpop.f32.mrf.mxu0 }
  0x9f   :  { %v103_v41 = vadd.f32 %v102_v39, %v80_v38 }
  0xa1   :  { %v123_v42 = vadd.f32 %v122_v40, %v103_v41 }
  0xa3   :  { %126 = vrot.lane.b32.xlu1 %v123_v42, %s170_s20 }
 0x115   :  { %v127_v56 = vpop.permute.xlu1 %126 }
 0x116   :  { %v130_v57 = vsel %vm129_vm5, %v79_v55, %v127_v56 }
 0x117   :  { %v161_v58 = vmul.f32 -1.442695, %v130_v57 }
 0x119   :  { %166 = vpow2.f32 %v161_v58 }
 0x11f   :  { %v167_v59 = vpop.eup %166 }
 0x120   :  { %v134_v60 = vadd.f32 1.0, %v167_v59 }
 0x122   :  { %168 = vrcp.f32 %v134_v60  ;;  %v146_v0 = vand.u32 2147483648, %v134_v60  ;;  %v144_v2 = vand.u32 2147483647, %v134_v60  ;;  %vm140_vm7 = vweird.f32 %v134_v60 }
 0x124   :  { %v147_v4 = vor.u32 1.1754944e-38, %v146_v0  ;;  %vm145_vm9 = vcmp.eq.f32.partialorder %v144_v2, 8.507059e+37 }
 0x128   :  { %v169_v61 = vpop.eup %168 }
 0x129   :  { %v136_v62 = vmul.f32 %v169_v61, %v134_v60  ;;  %vm141_vm6 = vweird.f32 %v169_v61 }
 0x12a   :  { %vm142_vm8 = vmor %vm140_vm7, %vm141_vm6 }
 0x12b   :  { %v137_v63 = vsub.f32 1.0, %v136_v62 }
 0x12d   :  { %v138_v1 = vmul.f32 %v169_v61, %v137_v63 }
 0x12f   :  { %v139_v3 = vadd.f32 %v169_v61, %v138_v1 }
 0x131   :  { %v143_v5 = vsel %vm142_vm8, %v169_v61, %v139_v3 }
 0x132   :  { %v148_v6 = vsel %vm145_vm9, %v147_v4, %v143_v5 }
 0x133   :  { %151 = vrot.lane.b32.xlu2 %v148_v6, %s171_s2 }
 0x18d   :  { %v152_v7 = vpop.permute.xlu2 %151 }
 0x18e   :  { %v154_v8 = vmul.f32 %v152_v7, %v148_v6 }
 0x190   :  { %155 = vst.msk [vmem:[%s296_s5] sm:$0xff] %vm129_vm5, %v154_v8 }

</bundles_post_ra>
